<compile_context>
chip_gen: v5e
topology: v5e:2x2
jax: 0.10.0
libtpu: 0.0.40
codegen_flags: <defaults>
</compile_context>

<pallas_src>
import functools

import jax
import jax.numpy as jnp
import numpy as np
from jax.experimental import pallas as pl
from jax.experimental.pallas import tpu as pltpu


# ----------------------------- Pallas kernel --------------------------------
def maf_kernel(xT_ref, w1T_ref, b1_ref, w2T_ref, b2_ref, zT_ref, ld_ref,
               *, dim, mxu_dtype):
    """One batch tile, transposed layout (features on sublanes, batch on lanes).

    xT_ref : (D,  Bt)  input tile (x^T), f32
    w1T_ref: (H,  D)   masked layer-1 weights, transposed, resident in VMEM
    b1_ref : (H,  1)   layer-1 bias (column -> lane broadcast is free)
    w2T_ref: (2D, H)   masked layer-2 weights (s rows then t rows), transposed
    b2_ref : (2D, 1)   layer-2 bias
    zT_ref : (D,  Bt)  output latent tile (z^T)
    ld_ref : (1,  Bt)  output log-det tile (lane-dense row)
    """
    xT = xT_ref[...]                                                    # (D, Bt) f32

    # MADE network: masked MLP with ReLU.  MXU operands in mxu_dtype (bf16 by
    # default), accumulation + all elementwise math in f32.
    h = jnp.dot(w1T_ref[...], xT.astype(mxu_dtype),
                preferred_element_type=jnp.float32)                     # (H, Bt) f32
    h = jnp.maximum(h + b1_ref[...], 0.0)

    st = jnp.dot(w2T_ref[...], h.astype(mxu_dtype),
                 preferred_element_type=jnp.float32) + b2_ref[...]      # (2D, Bt) f32
    s = st[:dim, :]                                                     # sublane-aligned
    t = jnp.clip(st[dim:, :], -6.0, 6.0)

    # Affine transform + log-det reduction (sublane reduce -> lane-dense row).
    zT_ref[...] = (xT - s) * jnp.exp(-t)
    ld_ref[...] = -jnp.sum(t, axis=0, keepdims=True)                    # (1, Bt)


# ------------------------------ tiling helpers --------------------------------
_MAX_B_TILE = 32768      # ~10-14 MiB/step incl. intermediates -> safe on v7x (64 MiB VMEM)
_VMEM_LIMIT = 48 * 1024 * 1024   # below v7x physical 64 MiB; plenty on v5e/v6e


def _round_up(x, m):
    return ((x + m - 1) // m) * m


def _auto_b_tile(batch):
    """Biggest lane tile that (a) keeps >=2 grid steps when possible (2 TCs on
    v7x) and (b) stays under the v7x VMEM cap."""
    half = _round_up(max(pl.cdiv(batch, 2), 1), 128)
    return max(128, min(_MAX_B_TILE, half))


# ------------------------------ wrappers --------------------------------------
def maf_forward_T(xT, w1_masked, b1, w2_masked, b2, *, b_tile=None, mxu_bf16=True):
    """Feature-major entry point (no wrapper-side transposes).

    xT        : (D, B) float32
    w1_masked : (D, H) pre-masked layer-1 weights ((in, out) orientation)
    b1        : (H,)
    w2_masked : (H, 2D) pre-masked layer-2 weights (s columns then t columns)
    b2        : (2D,)
    returns   : zT (D, B) float32, log_det (B,) float32
    """
    D, B = xT.shape
    H = w1_masked.shape[1]
    assert w1_masked.shape == (D, H)
    assert w2_masked.shape == (H, 2 * D)

    if b_tile is None:
        b_tile = _auto_b_tile(B)
    assert b_tile % 128 == 0, "batch tile must be a multiple of 128 (lane width)"
    n_tiles = pl.cdiv(B, b_tile)          # ragged last block handled by Pallas masking

    mxu_dtype = jnp.bfloat16 if mxu_bf16 else jnp.float32

    # One-time parameter re-layout (folds into constants under jit).
    w1T = jnp.transpose(w1_masked).astype(mxu_dtype)      # (H, D)
    w2T = jnp.transpose(w2_masked).astype(mxu_dtype)      # (2D, H): s rows then t rows
    b1c = b1.reshape(H, 1).astype(jnp.float32)
    b2c = b2.reshape(2 * D, 1).astype(jnp.float32)

    kernel = functools.partial(maf_kernel, dim=D, mxu_dtype=mxu_dtype)

    cost = pl.CostEstimate(
        flops=int(2 * B * 3 * D * H),                 # D*H + H*2D MACs per sample
        transcendentals=int(B * D),                   # exp(-t)
        bytes_accessed=int(4 * B * (2 * D + 1) + 4 * (3 * D * H + H + 2 * D)),
    )

    zT, ld = pl.pallas_call(
        kernel,
        out_shape=(
            jax.ShapeDtypeStruct((D, B), jnp.float32),
            jax.ShapeDtypeStruct((1, B), jnp.float32),
        ),
        grid_spec=pltpu.PrefetchScalarGridSpec(
            num_scalar_prefetch=0,
            grid=(n_tiles,),
            in_specs=[
                pl.BlockSpec((D, b_tile), lambda i: (0, i)),    # x^T tile (streamed)
                pl.BlockSpec((H, D), lambda i: (0, 0)),         # weights: resident
                pl.BlockSpec((H, 1), lambda i: (0, 0)),
                pl.BlockSpec((2 * D, H), lambda i: (0, 0)),
                pl.BlockSpec((2 * D, 1), lambda i: (0, 0)),
            ],
            out_specs=(
                pl.BlockSpec((D, b_tile), lambda i: (0, i)),    # z^T tile
                pl.BlockSpec((1, b_tile), lambda i: (0, i)),    # log-det row (lane-dense)
            ),
        ),
        compiler_params=pltpu.CompilerParams(
            dimension_semantics=("parallel",),                  # shard batch grid across TCs
            vmem_limit_bytes=_VMEM_LIMIT,
        ),
        cost_estimate=cost,
    )(xT, w1T, b1c, w2T, b2c)

    return zT, ld[0]


def maf_forward(x, w1_masked, b1, w2_masked, b2, **kwargs):
    """(B, D) interface matching the PyTorch module.

    NOTE: this adds two full-HBM transpose passes around the kernel; prefer
    maf_forward_T with feature-major (D, B) data when the surrounding graph
    allows it (the kernel itself streams fewer bytes than these transposes).
    """
    zT, log_det = maf_forward_T(jnp.transpose(x), w1_masked, b1, w2_masked, b2,
                                **kwargs)
    return jnp.transpose(zT), log_det


# --------------------- deterministic parameter setup -------------------------
def made_masks(dim, hidden):
    """Standard MADE masks for dim -> hidden -> 2*dim (s,t each autoregressive)."""
    in_deg = np.arange(1, dim + 1)                               # (D,)
    hid_deg = (np.arange(hidden) % max(dim - 1, 1)) + 1          # (H,)
    out_deg = np.tile(np.arange(1, dim + 1), 2)                  # (2D,)
    m1 = (hid_deg[None, :] >= in_deg[:, None]).astype(np.float32)   # (D, H)
    m2 = (out_deg[None, :] > hid_deg[:, None]).astype(np.float32)   # (H, 2D)
    return m1, m2


def init_params(key, dim, hidden):
    k1, k2, k3, k4 = jax.random.split(key, 4)
    w1 = jax.random.normal(k1, (dim, hidden), jnp.float32) * (1.0 / np.sqrt(dim))
    b1 = jax.random.normal(k2, (hidden,), jnp.float32) * 0.01
    w2 = jax.random.normal(k3, (hidden, 2 * dim), jnp.float32) * (1.0 / np.sqrt(hidden))
    b2 = jax.random.normal(k4, (2 * dim,), jnp.float32) * 0.01
    m1, m2 = made_masks(dim, hidden)
    return w1 * jnp.asarray(m1), b1, w2 * jnp.asarray(m2), b2


# ------------------------------ reference ------------------------------------
def maf_reference(x, w1m, b1, w2m, b2, mxu_dtype=jnp.float32):
    """Plain-JAX reference; mxu_dtype=bf16 emulates the kernel's MXU-operand cast."""
    D = x.shape[1]
    q = lambda a: a.astype(mxu_dtype).astype(jnp.float32)
    h = jnp.maximum(q(x) @ q(w1m) + b1, 0.0)
    st = q(h) @ q(w2m) + b2
    s, t = st[:, :D], jnp.clip(st[:, D:], -6.0, 6.0)
    return (x - s) * jnp.exp(-t), -t.sum(axis=1)


# ------------------------------- main ----------------------------------------
if __name__ == "__main__":
    DIM = 8        # flow dimension
    HIDDEN = 32    # MADE hidden width
    BATCH = 256    # small demo batch; exercises a 2-step grid (b_tile=128)

    key = jax.random.PRNGKey(0)
    kx, kp = jax.random.split(key)
    x = jax.random.normal(kx, (BATCH, DIM), jnp.float32)
    w1m, b1, w2m, b2 = init_params(kp, DIM, HIDDEN)

    # Exact-f32 path (bit-comparable to the plain-JAX reference).
    z32, ld32 = maf_forward(x, w1m, b1, w2m, b2, mxu_bf16=False)
    # Default fast path: bf16 MXU operands, f32 accumulation / elementwise math.
    zbf, ldbf = maf_forward(x, w1m, b1, w2m, b2)
    jax.block_until_ready((z32, ld32, zbf, ldbf))

    z_ref, ld_ref = maf_reference(x, w1m, b1, w2m, b2)                       # pure f32
    z_rbf, ld_rbf = maf_reference(x, w1m, b1, w2m, b2, jnp.bfloat16)         # bf16 emulation

    assert z32.shape == (BATCH, DIM) and ld32.shape == (BATCH,)
    assert zbf.shape == (BATCH, DIM) and ldbf.shape == (BATCH,)
    # f32 path: tight check against the f32 reference.
    assert jnp.allclose(z32, z_ref, atol=1e-5), "f32 z mismatch"
    assert jnp.allclose(ld32, ld_ref, atol=1e-5), "f32 log_det mismatch"
    # bf16-MXU path: tight vs bf16-emulated reference, loose vs pure-f32 reference.
    assert jnp.allclose(zbf, z_rbf, atol=5e-3, rtol=5e-3), "bf16 z mismatch"
    assert jnp.allclose(ldbf, ld_rbf, atol=5e-3, rtol=5e-3), "bf16 log_det mismatch"
    assert jnp.allclose(zbf, z_ref, atol=5e-2, rtol=5e-2), "bf16 z drift vs f32 ref"

    print("KERNEL_OK")
</pallas_src>

<mosaic_0001>
module attributes {stable_mosaic.version = 11 : i64} {
  func.func @maf_kernel(%arg0: i32, %arg1: memref<8x128xf32, #tpu.memory_space<vmem>>, %arg2: memref<32x8xf32, #tpu.memory_space<vmem>>, %arg3: memref<32x1xf32, #tpu.memory_space<vmem>>, %arg4: memref<16x32xf32, #tpu.memory_space<vmem>>, %arg5: memref<16x1xf32, #tpu.memory_space<vmem>>, %arg6: memref<8x128xf32, #tpu.memory_space<vmem>>, %arg7: memref<1x128xf32, #tpu.memory_space<vmem>>) attributes {dimension_semantics = [#tpu.dimension_semantics<parallel>], iteration_bounds = array<i64: 2>, scalar_prefetch = 0 : i64, scratch_operands = 0 : i64, tpu.core_type = #tpu.core_type<tc>, window_params = [{transform_indices = @transform_0, window_bounds = array<i64: 8, 128>}, {pipeline_mode = #tpu.pipeline_mode<synchronous>, transform_indices = @transform_1, window_bounds = array<i64: 32, 8>}, {pipeline_mode = #tpu.pipeline_mode<synchronous>, transform_indices = @transform_2, window_bounds = array<i64: 32, 1>}, {pipeline_mode = #tpu.pipeline_mode<synchronous>, transform_indices = @transform_3, window_bounds = array<i64: 16, 32>}, {pipeline_mode = #tpu.pipeline_mode<synchronous>, transform_indices = @transform_4, window_bounds = array<i64: 16, 1>}, {transform_indices = @transform_5, window_bounds = array<i64: 8, 128>}, {transform_indices = @transform_6, window_bounds = array<i64: 1, 128>}]} {
    %c0 = arith.constant 0 : index
    %c0_0 = arith.constant 0 : index
    %0 = vector.load %arg1[%c0, %c0_0] : memref<8x128xf32, #tpu.memory_space<vmem>>, vector<8x128xf32>
    %c0_1 = arith.constant 0 : index
    %c0_2 = arith.constant 0 : index
    %1 = vector.load %arg2[%c0_1, %c0_2] : memref<32x8xf32, #tpu.memory_space<vmem>>, vector<32x8xf32>
    %cst = arith.constant dense<0.000000e+00> : vector<32x128xf32>
    %2 = tpu.matmul %1, %0, %cst {dimension_numbers = #tpu.dot_dimension_numbers<[1], [0], [0], [1], [0, 0, 1, 1], [], []>} : vector<32x8xf32>, vector<8x128xf32>, vector<32x128xf32> -> vector<32x128xf32>
    %c0_3 = arith.constant 0 : index
    %c0_4 = arith.constant 0 : index
    %3 = vector.load %arg3[%c0_3, %c0_4] : memref<32x1xf32, #tpu.memory_space<vmem>>, vector<32x1xf32>
    %4 = vector.broadcast %3 : vector<32x1xf32> to vector<32x128xf32>
    %5 = arith.addf %2, %4 : vector<32x128xf32>
    %cst_5 = arith.constant 0.000000e+00 : f32
    %6 = vector.broadcast %cst_5 : f32 to vector<32x128xf32>
    %7 = arith.maximumf %5, %6 : vector<32x128xf32>
    %c0_6 = arith.constant 0 : index
    %c0_7 = arith.constant 0 : index
    %8 = vector.load %arg4[%c0_6, %c0_7] : memref<16x32xf32, #tpu.memory_space<vmem>>, vector<16x32xf32>
    %cst_8 = arith.constant dense<0.000000e+00> : vector<16x128xf32>
    %9 = tpu.matmul %8, %7, %cst_8 {dimension_numbers = #tpu.dot_dimension_numbers<[1], [0], [0], [1], [0, 0, 1, 1], [], []>} : vector<16x32xf32>, vector<32x128xf32>, vector<16x128xf32> -> vector<16x128xf32>
    %c0_9 = arith.constant 0 : index
    %c0_10 = arith.constant 0 : index
    %10 = vector.load %arg5[%c0_9, %c0_10] : memref<16x1xf32, #tpu.memory_space<vmem>>, vector<16x1xf32>
    %11 = vector.broadcast %10 : vector<16x1xf32> to vector<16x128xf32>
    %12 = arith.addf %9, %11 : vector<16x128xf32>
    %13 = vector.extract_strided_slice %12 {offsets = [0, 0], sizes = [8, 128], strides = [1, 1]} : vector<16x128xf32> to vector<8x128xf32>
    %14 = vector.extract_strided_slice %12 {offsets = [8, 0], sizes = [8, 128], strides = [1, 1]} : vector<16x128xf32> to vector<8x128xf32>
    %cst_11 = arith.constant -6.000000e+00 : f32
    %cst_12 = arith.constant 6.000000e+00 : f32
    %15 = vector.broadcast %cst_11 : f32 to vector<8x128xf32>
    %16 = arith.maximumf %15, %14 : vector<8x128xf32>
    %17 = vector.broadcast %cst_12 : f32 to vector<8x128xf32>
    %18 = arith.minimumf %17, %16 : vector<8x128xf32>
    %19 = arith.subf %0, %13 : vector<8x128xf32>
    %cst_13 = arith.constant 0.000000e+00 : f32
    %20 = vector.broadcast %cst_13 : f32 to vector<8x128xf32>
    %21 = arith.subf %20, %18 : vector<8x128xf32>
    %22 = math.exp %21 : vector<8x128xf32>
    %23 = arith.mulf %19, %22 : vector<8x128xf32>
    %c0_14 = arith.constant 0 : index
    %c0_15 = arith.constant 0 : index
    %24 = vector.load %arg6[%c0_14, %c0_15] : memref<8x128xf32, #tpu.memory_space<vmem>>, vector<8x128xf32>
    tpu.vector_store %arg6[%c0_14, %c0_15], %23 {strides = array<i32>} : memref<8x128xf32, #tpu.memory_space<vmem>>, vector<8x128xf32>,
    %cst_16 = arith.constant dense<0.000000e+00> : vector<128xf32>
    %25 = vector.multi_reduction <add>, %18, %cst_16 [0] : vector<8x128xf32> to vector<128xf32>
    %26 = vector.shape_cast %25 : vector<128xf32> to vector<1x128xf32>
    %cst_17 = arith.constant 0.000000e+00 : f32
    %27 = vector.broadcast %cst_17 : f32 to vector<1x128xf32>
    %28 = arith.subf %27, %26 : vector<1x128xf32>
    %c0_18 = arith.constant 0 : index
    %c0_19 = arith.constant 0 : index
    %29 = vector.load %arg7[%c0_18, %c0_19] : memref<1x128xf32, #tpu.memory_space<vmem>>, vector<1x128xf32>
    tpu.vector_store %arg7[%c0_18, %c0_19], %28 {strides = array<i32>} : memref<1x128xf32, #tpu.memory_space<vmem>>, vector<1x128xf32>,
    return
  }
  func.func @transform_0(%arg0: i32) -> (i32, i32) {
    %c0_i32 = arith.constant 0 : i32
    %c0_i32_0 = arith.constant 0 : i32
    return %c0_i32, %arg0 : i32, i32
  }
  func.func @transform_1(%arg0: i32) -> (i32, i32) {
    %c0_i32 = arith.constant 0 : i32
    %c0_i32_0 = arith.constant 0 : i32
    %c0_i32_1 = arith.constant 0 : i32
    return %c0_i32, %c0_i32_0 : i32, i32
  }
  func.func @transform_2(%arg0: i32) -> (i32, i32) {
    %c0_i32 = arith.constant 0 : i32
    %c0_i32_0 = arith.constant 0 : i32
    %c0_i32_1 = arith.constant 0 : i32
    return %c0_i32, %c0_i32_0 : i32, i32
  }
  func.func @transform_3(%arg0: i32) -> (i32, i32) {
    %c0_i32 = arith.constant 0 : i32
    %c0_i32_0 = arith.constant 0 : i32
    %c0_i32_1 = arith.constant 0 : i32
    return %c0_i32, %c0_i32_0 : i32, i32
  }
  func.func @transform_4(%arg0: i32) -> (i32, i32) {
    %c0_i32 = arith.constant 0 : i32
    %c0_i32_0 = arith.constant 0 : i32
    %c0_i32_1 = arith.constant 0 : i32
    return %c0_i32, %c0_i32_0 : i32, i32
  }
  func.func @transform_5(%arg0: i32) -> (i32, i32) {
    %c0_i32 = arith.constant 0 : i32
    %c0_i32_0 = arith.constant 0 : i32
    return %c0_i32, %arg0 : i32, i32
  }
  func.func @transform_6(%arg0: i32) -> (i32, i32) {
    %c0_i32 = arith.constant 0 : i32
    %c0_i32_0 = arith.constant 0 : i32
    return %c0_i32, %arg0 : i32, i32
  }
}

</mosaic_0001>

<bundles_post_ra>
// kernel: tpu_custom_call.1
= control target key start
LH: loop header
LB: loop body
LE: loop exit
PB: predicated region body
PF: predicated region fallthrough
CT: control target
= control target key end

     0   :  { %12 = vsyncpa [#allocation3], 0  ;;  %s874_s0 = inlined_call_operand.vmem [shape: f32[8,256], index: 0, kind: input, shape index: {}]   ;;  %s875_s1 = inlined_call_operand.vmem [shape: f32[32,8], index: 1, kind: input, shape index: {}]   ;;  %s876_s2 = inlined_call_operand.vmem [shape: f32[32,1], index: 2, kind: input, shape index: {}]   ;;  %s877_s3 = inlined_call_operand.vmem [shape: f32[16,32], index: 3, kind: input, shape index: {}]   ;;  %s878_s4 = inlined_call_operand.vmem [shape: f32[16,1], index: 4, kind: input, shape index: {}]   ;;  %s879_s5 = inlined_call_operand.hbm [shape: f32[8,256], index: 5, kind: output, shape index: {0}]   ;;  %s880_s6 = inlined_call_operand.hbm [shape: f32[1,256], index: 6, kind: output, shape index: {1}]  }
   0x1   :  { %14 = vsyncpa [#allocation3 + $0x1], 0 }
   0x2   :  { %15 = vsyncpa [#allocation5], 0 }
   0x3   :  { %17 = vsyncpa [#allocation5 + $0x1], 0  ;;  %s716_s21 = smov 0   ;;  %s718_s22 = smov 0  }
   0x4   :  { %s720_s23 = smov 0   ;;  %s722_s24 = smov 0  }
   0x5 LB: > { %s737_s25 = sadd.s32 4294967295, %s678_s24   ;;  %s512_s26 = sadd.s32 4294967294, %s678_s24   ;;  %s678_s24 = sphi %s722_s24, %s886_s24   ;;  %s674_s23 = sphi %s720_s23, %s885_s23   ;;  %s670_s22 = sphi %s718_s22, %s884_s22   ;;  %s666_s21 = sphi %s716_s21, %s883_s21  }
   0x6   : > { %s741_s27 = sadd.s32 1, %s678_s24   ;;  %s140_s28 = sadd.s32 1, %s674_s23 }
   0x7   : > { %s137_s29 = ssub.s32 %s678_s24, %s741_s27  ;;  %p150_p0 = scmp.ne.s32.totalorder %s674_s23, %s670_s22 }
   0x8   : > { %p138_p1 = scmp.eq.s32.totalorder %s137_s29, 0  ;;  %p151_p2 = scmp.eq.s32.totalorder %s737_s25, 1 }
   0x9   : > { %p156_p3 = scmp.ne.s32.totalorder %s670_s22, %s666_s21  ;;  %p157_p4 = scmp.eq.s32.totalorder %s512_s26, 1 }
   0xa   : > { %s752_s30 = scalar_select %p138_p1, %s674_s23, %s140_s28  }
   0xb   : > { %p754_p5 = por %p151_p2, %p150_p0  ;;  %p758_p6 = por %p157_p4, %p156_p3 }
   0xc   : > { %p515_p7 = scmp.ge.s32.totalorder %s678_s24, 1  ;;  %p220_p8 = scmp.lt.s32.totalorder %s678_s24, 3 }
   0xe   : > { %p221_p9 = pnand %p515_p7, %p220_p8 }
   0xf   : > { %p253_p10 = scmp.lt.s32.totalorder (!%p221_p9), %s737_s25, 1  ;;  %s810_s29 = sand.u32 (!%p221_p9), 1, %s670_s22  }
  0x10   : > { %224 = sbr.rel (%p221_p9) target bundleno = 342 (0x156), region = 40  ;;  %s516_s9 = sshll.u32 (!%p221_p9), %s810_s29, 3 }
  0x11   : > { %s526_s10 = sshll.u32 (!%p221_p9), %s737_s25, 3  ;;  %s420_s16 = scalar_lea.hbm (!%p221_p9), %s880_s6, %s737_s25 }
  0x12   : > { %s252_s20 = scalar_lea.vmem (!%p221_p9), [#allocation4], %s810_s29  ;;  %s825_s28 = sshll.u32 (!%p221_p9), %s420_s16, 4  ;;  %s425_s28 = int_to_ptr.hbm [resolvable:$true] %s825_s28 }
  0x13   : > { %s823_s26 = sshll.u32 (!%p221_p9), %s252_s20, 4  ;;  %s423_s26 = int_to_ptr.vmem [resolvable:$true] %s823_s26 }
  0x15   : > { %v680_v0 = vmov 0   ;;  %v265_v1 = vld [vmem:[%s876_s2 + $0x18] sm:$0xff]  ;;  %v263_v2 = vld [vmem:[%s876_s2 + $0x8] sm:$0xff]  ;;  %s254_s13 = scalar_select %p253_p10, %s737_s25, 1  ;;  %v260_v3 = vld [vmem:[%s875_s1 + $0x10] sm:$0xff]  ;;  %vm286_vm0 = vcmask 64512  }
  0x16   : > { %579 = vset.pattern.permute.xlu0 %v680_v0  ;;  %580 = vset.pattern.permute.xlu1 %v680_v0  ;;  %v258_v4 = vld [vmem:[%s875_s1] sm:$0xff]  ;;  %v264_v6 = vld [vmem:[%s876_s2 + $0x10] sm:$0xff]  ;;  %v261_v8 = vld [vmem:[%s875_s1 + $0x18] sm:$0xff]  ;;  %vm346_vm1 = vcmask 261120   ;;  %s393_s25 = scalar_lea.sflag [#allocation3], %s810_s29 }
  0x17   : > { %283 = vperm.xlu0 %579, %v265_v1   ;;  %273 = vperm.xlu1 %580, %v263_v2   ;;  %s517_s14 = sshll.u32 %s254_s13, 3  ;;  %v262_v7 = vld [vmem:[%s876_s2] sm:$0xff]  ;;  %v259_v9 = vld [vmem:[%s875_s1 + $0x8] sm:$0xff]  ;;  %s407_s13 = scalar_lea.hbm %s879_s5, %s526_s10 }
  0x18   : > { %581 = vset.pattern.permute.xlu2 %v680_v0  ;;  %s256_s17 = scalar_lea.vmem %s874_s0, %s517_s14  ;;  %v335_v10 = vld [vmem:[%s878_s4 + $0x8] sm:$0xff]  ;;  %v334_v11 = vld [vmem:[%s878_s4] sm:$0xff]  ;;  %s411_s19 = sshll.u32 %s407_s13, 4  ;;  %s412_s19 = int_to_ptr.hbm [resolvable:$true] %s411_s19 }
  0x19   : > { %v781_v5 = vld [vmem:[%s256_s17] sm:$0xff]  ;;  %343 = vperm.xlu2 %581, %v335_v10   ;;  %v333_v28 = vld [vmem:[%s877_s3 + $0x8] sm:$0xff]  ;;  %s246_s17 = scalar_lea.vmem [#allocation2], %s516_s9  ;;  %s598_s9 = sshra.s32 %s412_s19, 4  ;;  %s599_s9 = int_to_ptr.hbm [resolvable:$true] %s598_s9 }
  0x1a   : > { %529 = vmatpush.msra.mxu2 %v781_v5  ;;  %314 = vmatpush.msra.mxu0 %v781_v5  ;;  %v332_v29 = vld [vmem:[%s877_s3] sm:$0xff]  ;;  %s409_s18 = sshll.u32 %s246_s17, 4  ;;  %s600_s10 = scalar_lea.hbm %s599_s9, 8  ;;  %s410_s18 = int_to_ptr.vmem [resolvable:$true] %s409_s18 }
  0x1b   : > { %520 = vmatmul.msk.f32.vlgmr.msra.gmra.mxu2 %vm286_vm0, %v260_v3  ;;  %518 = vmatmul.msk.f32.vlgmr.msra.gmra.mxu0 %vm286_vm0, %v258_v4  ;;  %p601_p11 = scmp.ne.s32.totalorder %s599_s9, %s600_s10  ;;  %s604_s13 = scalar_lea.hbm %s879_s5, 16 }
  0x1c   : > { %p605_p0 = scmp.lt.s32.totalorder %s599_s9, %s879_s5  ;;  %p606_p1 = scmp.lt.s32.totalorder %s604_s13, %s600_s10 }
  0x1d   : > { %p602_p12 = pnand %p601_p11, %p754_p5 }
  0x1e   : > { %p607_p2 = por %p606_p1, %p605_p0 }
  0x1f   : > { %278 = vperm.xlu0 %579, %v264_v6   ;;  %268 = vperm.xlu1 %580, %v262_v7   ;;  %p603_p13 = pneg %p602_p12 }
  0x21   : > { %338 = vperm.xlu2 %581, %v334_v11   ;;  %p608_p3 = pnand %p607_p2, %p603_p13 }
  0x23   : > { %521 = vmatmul.msk.f32.gmra.mxu2 %vm286_vm0, %v261_v8  ;;  %519 = vmatmul.msk.f32.gmra.mxu0 %vm286_vm0, %v259_v9 }
  0x73   : > { %v344_v30 = vpop.permute.xlu2 %343 }
  0x7b   : > { %v339_v36 = vpop.permute.xlu2 %338 }
  0x89   : > { %v284_v12 = vpop.permute.xlu0 %283  ;;  %v274_v14 = vpop.permute.xlu1 %273 }
  0x91   : > { %v279_v16 = vpop.permute.xlu0 %278  ;;  %v269_v21 = vpop.permute.xlu1 %268 }
  0x98   : > { %v316_v13 = vpop.f32.mrf.mxu0 }
  0x99   : > { %v317_v25 = vadd.f32 %v316_v13, %v269_v21 }
  0x9b   : > { %v328_v27 = vmax.f32 %v317_v25, 0.0 }
  0x9e   : > { %v322_v15 = vpop.f32.mrf.mxu2 }
  0x9f   : > { %v323_v19 = vadd.f32 %v322_v15, %v279_v16 }
  0xa0   : > { %v319_v17 = vpop.f32.mrf.mxu0 }
  0xa1   : > { %v320_v22 = vadd.f32 %v319_v17, %v274_v14  ;;  %v330_v24 = vmax.f32 %v323_v19, 0.0 }
  0xa3   : > { %v329_v26 = vmax.f32 %v320_v22, 0.0 }
  0xa6   : > { %v325_v18 = vpop.f32.mrf.mxu2 }
  0xa7   : > { %v326_v20 = vadd.f32 %v325_v18, %v284_v12 }
  0xa9   : > { %v331_v23 = vmax.f32 %v326_v20, 0.0 }
  0xab   : > { %365 = vmatpush.msra.mxu1 %v331_v23  ;;  %530 = vmatpush.msra.mxu3 %v331_v23 }
  0xad   : > { %366 = vmatpush.msra.mxu1 %v330_v24  ;;  %531 = vmatpush.msra.mxu3 %v330_v24 }
  0xaf   : > { %367 = vmatpush.msra.mxu1 %v329_v26  ;;  %532 = vmatpush.msra.mxu3 %v329_v26 }
  0xb1   : > { %368 = vmatpush.msra.mxu1 %v328_v27  ;;  %533 = vmatpush.msra.mxu3 %v328_v27 }
  0xb2   : > { %523 = vmatmul.msk.f32.vlgmr.msra.gmra.mxu3 %vm346_vm1, %v333_v28  ;;  %522 = vmatmul.msk.f32.vlgmr.msra.gmra.mxu1 %vm346_vm1, %v332_v29 }
 0x12f   : > { %v370_v37 = vpop.f32.mrf.mxu1 }
 0x130   : > { %v371_v41 = vadd.f32 %v370_v37, %v339_v36 }
 0x132   : > { %v378_v44 = vsub.f32 %v781_v5, %v371_v41 }
 0x135   : > { %v373_v31 = vpop.f32.mrf.mxu3 }
 0x136   : > { %v374_v32 = vadd.f32 %v373_v31, %v344_v30 }
 0x138   : > { %v524_v33 = vclamps-f32 %v374_v32, 6.0 }
 0x13a   : > { %v379_v34 = vsub.f32 0.0, %v524_v33  ;;  %v384_v35 = vrot.slane %v524_v33, 4 }
 0x13c   : > { %v380_v38 = vmul.f32 1.442695, %v379_v34  ;;  %v385_v39 = vadd.f32 %v524_v33, %v384_v35 }
 0x13e   : > { %582 = vpow2.f32 %v380_v38  ;;  %v386_v40 = vrot.slane %v385_v39, 2 }
 0x140   : > { %v387_v42 = vadd.f32 %v386_v40, %v385_v39 }
 0x142   : > { %v388_v43 = vrot.slane %v387_v42, 1 }
 0x144   : > { %v583_v45 = vpop.eup %582  ;;  %v389_v46 = vadd.f32 %v388_v43, %v387_v42 }
 0x145   : > { %v382_v47 = vmul.f32 %v583_v45, %v378_v44 }
 0x146   : > { %v390_v48 = vsub.f32 0.0, %v389_v46 }
 0x147   : > { %383 = vst [vmem:[%s246_s17] sm:$0xff] %v382_v47 }
 0x148   : > { %611 = shalt.err (!%p608_p3)
}
 0x149   : > { %534 = dma.vmem_to_hbm [thread:$0]  (%p754_p5), %s410_s18, 128, %s412_s19, %s393_s25   ;;  %391 = vst [vmem:[%s252_s20] sm:$0x1] %v390_v48 }
 0x14a   : > { %s398_s16 = scalar_lea.sflag [#allocation5], %s810_s29  ;;  %s626_s17 = sshra.s32 %s425_s28, 4  ;;  %s627_s17 = int_to_ptr.hbm [resolvable:$true] %s626_s17 }
 0x14b   : > { %s628_s11 = scalar_lea.hbm %s627_s17, 1  ;;  %s632_s12 = scalar_lea.hbm %s880_s6, 2 }
 0x14c   : > { %p629_p4 = scmp.ne.s32.totalorder %s627_s17, %s628_s11  ;;  %p633_p9 = scmp.lt.s32.totalorder %s627_s17, %s880_s6 }
 0x14d   : > { %p634_p10 = scmp.lt.s32.totalorder %s632_s12, %s628_s11 }
 0x14e   : > { %p630_p7 = pnand %p629_p4, %p754_p5 }
 0x14f   : > { %p635_p11 = por %p634_p10, %p633_p9 }
 0x150   : > { %p631_p8 = pneg %p630_p7 }
 0x152   : > { %p636_p12 = pnand %p635_p11, %p631_p8 }
 0x154   : > { %639 = shalt.err (!%p636_p12)
}
 0x155   : > { %535 = dma.vmem_to_hbm [thread:$0]  (%p754_p5), %s423_s26, 16, %s425_s28, %s398_s16  }
 0x156 PF: > { %p545_p13 = scmp.ge.s32.totalorder %s678_s24, 2  ;;  %s436_s29 = sand.u32 1, %s666_s21  }
 0x157   : > { %s437_s18 = scalar_lea.sflag [#allocation3], %s436_s29 }
 0x158   : > { %p539_p0 = pnand %p545_p13, %p758_p6 }
 0x15a   : > { %p540_p1 = pneg %p539_p0 }
 0x15c   : > { %657 = dma.done.wait (%p540_p1), %s437_s18, 128  }
 0x15d   : > { %659 = vsyncadd (%p540_p1), %s437_s18, 4294967168  ;;  %s447_s19 = scalar_lea.sflag [#allocation5], %s436_s29 }
 0x15e   : > { %661 = dma.done.wait (%p540_p1), %s447_s19, 16  }
 0x15f   : > { %663 = vsyncadd (%p540_p1), %s447_s19, 4294967280  ;;  %p20_p5 = scmp.ge.s32.totalorder %s741_s27, 4   ;;  %s883_s21 = smov %s670_s22 }
 0x160   : > { %s884_s22 = smov %s674_s23  ;;  %s885_s23 = smov %s752_s30 }
 0x161   : > { %s886_s24 = smov %s741_s27  ;;  %22 = sbr.rel (!%p20_p5) target bundleno = 5 (0x5), region = 92 }
 0x166   :  { %452 = vsyncpa [#allocation3], 1 }
 0x167   :  { %454 = vsyncpa [#allocation3 + $0x1], 1 }
 0x168   :  { %455 = vsyncpa [#allocation5], 1 }
 0x169   :  { %457 = vsyncpa [#allocation5 + $0x1], 1 }

</bundles_post_ra>
